<compile_context>
chip_gen: v5e
topology: v5e:2x2
jax: 0.10.0
libtpu: 0.0.40
codegen_flags: <defaults>
</compile_context>

<pallas_src>
import functools

import jax
import jax.numpy as jnp
from jax import lax
from jax.experimental import pallas as pl
from jax.experimental.pallas import tpu as pltpu

_LANES = 128
_TEMP_ARRS = 4          # bounded full-width f32 temporaries per sub-block (estimate)
_SUB_ROWS = 256         # rows per in-kernel sub-block (single C block path)
_SUB_ROWS_SPLIT = 128   # rows per in-kernel sub-block (C-split path)
_MIN_TILE_B = 256       # below this many rows per step, switch to the C-split kernel
_SPLIT_TILE_C = 2048    # class-chunk width (lanes) for the C-split kernel
_MIN_BATCH_STEPS = 8    # keep the batch grid at least this long when N allows


def _round_up(x, m):
    return ((x + m - 1) // m) * m


def _cdiv(a, b):
    return -(-a // b)


def _vmem_budgets():
    """(vmem_limit_bytes, tile_budget_bytes), generation-aware with headroom."""
    cap = 64 * 1024 * 1024  # conservative default (v7x per-core VMEM)
    try:
        cap = int(pltpu.get_tpu_info().vmem_capacity_bytes)
    except Exception:
        pass
    # v7x (64 MiB): limit 48 MiB / budget ~28.8 MiB; v5e/v6e (128 MiB): 96 / ~57.6 MiB.
    limit = min((cap * 3) // 4, 100 * 1024 * 1024)
    budget = (limit * 3) // 5
    return limit, budget


def _choose_tiles(n, c, itemsize, budget, tile_b_req=None, tile_c_req=None):
    """Pick (tile_b, tile_c, sub_rows, split) from the VMEM budget."""
    c_lanes = _round_up(c, _LANES)  # lane-padded footprint of a full row

    # ---- class (lane) axis: single full-C block vs. C-split online reduction ----
    if tile_c_req is not None:
        tile_c = c if tile_c_req >= c else max(_round_up(tile_c_req, _LANES), _LANES)
    else:
        temps = _TEMP_ARRS * _SUB_ROWS * c_lanes * 4
        per_row = 2 * 2 * c_lanes * itemsize           # 2 inputs x 2 pipeline buffers
        rows_fit = (budget - temps) // per_row
        tile_c = c if rows_fit >= _MIN_TILE_B else min(_SPLIT_TILE_C, c_lanes)
        if tile_c >= c:
            tile_c = c
    split = tile_c < c

    lanes = _round_up(tile_c, _LANES) if split else c_lanes
    sub = _SUB_ROWS_SPLIT if split else _SUB_ROWS

    # ---- batch (sublane) axis: as big as the budget allows, >= _MIN_BATCH_STEPS
    #      grid steps for large N (keeps both v7x TCs fed, bounds padding waste) ----
    if tile_b_req is not None:
        tile_b = max(_round_up(tile_b_req, _LANES), _LANES)
    else:
        temps = _TEMP_ARRS * sub * lanes * 4
        acc = 4 * _LANES * 4 if split else 0            # (tile_b,1) f32 accs, lane-padded
        per_row = 2 * 2 * lanes * itemsize + acc
        rows_fit = max((budget - temps) // per_row, _LANES)
        tile_b = (rows_fit // _LANES) * _LANES
        steps_cap = _round_up(_cdiv(n, _MIN_BATCH_STEPS), _LANES)
        tile_b = max(_LANES, min(tile_b, steps_cap, _round_up(n, _LANES)))

    if tile_b % sub != 0:
        sub = _LANES
    return tile_b, tile_c, sub, split


def _identity128():
    rows = lax.broadcasted_iota(jnp.int32, (_LANES, _LANES), 0)
    cols = lax.broadcasted_iota(jnp.int32, (_LANES, _LANES), 1)
    return (rows == cols).astype(jnp.float32)


def _store_col_as_lanes(loss_col, loss_ref, row0, eye):
    """Store a (rows, 1) f32 column into loss_ref[0, row0:row0+rows] lane-major.

    lane[0, j] = sum_k col[k, 0] * eye[k, j] = col[j, 0]  -- one 1x128x128 MXU
    matmul per 128 rows replaces the old VPU select + sublane-reduce relayout.
    """
    rows = loss_col.shape[0]
    for k in range(rows // _LANES):
        col_k = loss_col[k * _LANES:(k + 1) * _LANES, :]           # (128, 1)
        lane_k = lax.dot_general(col_k, eye, (((0,), (0,)), ((), ())),
                                 preferred_element_type=jnp.float32)  # (1, 128)
        start = row0 + k * _LANES
        if not isinstance(start, int):
            start = pl.multiple_of(start, _LANES)
        loss_ref[:, pl.ds(start, _LANES)] = lane_k


def _ce_kernel_1pass(pred_ref, gt_ref, loss_ref, *, sub):
    """Single C block: pred/gt (tile_b, C); loss (1, tile_b) lane-major."""
    eye = _identity128()
    nsub = pred_ref.shape[0] // sub

    def process(r0):
        p = pred_ref[pl.ds(r0, sub), :].astype(jnp.float32)
        g = gt_ref[pl.ds(r0, sub), :]
        m = jnp.max(p, axis=-1, keepdims=True)
        s = jnp.sum(jnp.exp(p - m), axis=-1, keepdims=True)
        g_sum = jnp.sum(g, axis=-1, keepdims=True, dtype=jnp.float32)
        pg_sum = jnp.sum(p * g, axis=-1, keepdims=True)
        # == -sum(log_softmax(p) * g, axis=-1), without full-width log_softmax temps.
        loss_col = (m + jnp.log(s)) * g_sum - pg_sum
        _store_col_as_lanes(loss_col, loss_ref, r0, eye)

    if nsub <= 8:
        for r in range(nsub):
            process(r * sub)
    else:
        def body(r, carry):
            process(pl.multiple_of(r * sub, sub))
            return carry
        lax.fori_loop(0, nsub, body, 0)


def _ce_kernel_csplit(pred_ref, gt_ref, loss_ref, m_acc, s_acc, g_acc, pg_acc, *, sub):
    """C-split: pred/gt (tile_b, tile_c) chunks, online logsumexp over the C grid axis."""
    j = pl.program_id(1)
    nsub = pred_ref.shape[0] // sub

    @pl.when(j == 0)
    def _():
        m_acc[...] = jnp.full_like(m_acc, -jnp.inf)
        s_acc[...] = jnp.zeros_like(s_acc)
        g_acc[...] = jnp.zeros_like(g_acc)
        pg_acc[...] = jnp.zeros_like(pg_acc)

    def process(r0):
        rows = pl.ds(r0, sub)
        p = pred_ref[rows, :].astype(jnp.float32)
        g = gt_ref[rows, :]
        m_old = m_acc[rows, :]
        m_new = jnp.maximum(m_old, jnp.max(p, axis=-1, keepdims=True))
        s_acc[rows, :] = (jnp.exp(m_old - m_new) * s_acc[rows, :]
                          + jnp.sum(jnp.exp(p - m_new), axis=-1, keepdims=True))
        m_acc[rows, :] = m_new
        g_acc[rows, :] = g_acc[rows, :] + jnp.sum(g, axis=-1, keepdims=True,
                                                  dtype=jnp.float32)
        pg_acc[rows, :] = pg_acc[rows, :] + jnp.sum(p * g, axis=-1, keepdims=True)

    if nsub <= 8:
        for r in range(nsub):
            process(r * sub)
    else:
        def body(r, carry):
            process(pl.multiple_of(r * sub, sub))
            return carry
        lax.fori_loop(0, nsub, body, 0)

    @pl.when(j == pl.num_programs(1) - 1)
    def _():
        eye = _identity128()
        loss_col = (m_acc[...] + jnp.log(s_acc[...])) * g_acc[...] - pg_acc[...]
        _store_col_as_lanes(loss_col, loss_ref, 0, eye)


def cross_entropy_loss(pred, gt, *, tile_b=None, tile_c=None):
    """loss[i] = -sum_c log_softmax(pred)[i, :] * gt[i, :]   (reduction='none')."""
    if pred.ndim != 2 or pred.shape != gt.shape:
        raise ValueError("pred and gt must both be [N, C]")
    n, c = pred.shape
    itemsize = max(jnp.dtype(pred.dtype).itemsize, jnp.dtype(gt.dtype).itemsize)
    vmem_limit, budget = _vmem_budgets()
    tb, tc, sub, split = _choose_tiles(n, c, itemsize, budget, tile_b, tile_c)

    # Pad the batch to a whole number of tiles (zero rows -> exactly 0 loss) and,
    # on the C-split path, pad classes to a whole number of chunks with a huge
    # negative logit (exp underflows to 0 and big_neg * 0-target == 0).
    n_pad = _round_up(max(n, 1), tb)
    c_pad = _round_up(c, tc) if split else c
    if n_pad != n:
        pred = jnp.pad(pred, ((0, n_pad - n), (0, 0)))
        gt = jnp.pad(gt, ((0, n_pad - n), (0, 0)))
    if c_pad != c:
        big_neg = float(jnp.finfo(pred.dtype).min) / 2.0
        pred = jnp.pad(pred, ((0, 0), (0, c_pad - c)), constant_values=big_neg)
        gt = jnp.pad(gt, ((0, 0), (0, c_pad - c)))

    nb = n_pad // tb
    out_shape = jax.ShapeDtypeStruct((nb, 1, tb), jnp.float32)
    # TODO(synk): for C < 128, a wrapper-side fold of rows into lanes would recover
    # the idle lanes of each vreg; skipped to keep the layout plumbing simple.

    if not split:
        out = pl.pallas_call(
            functools.partial(_ce_kernel_1pass, sub=sub),
            out_shape=out_shape,
            grid=(nb,),
            in_specs=[pl.BlockSpec((tb, c_pad), lambda i: (i, 0)),
                      pl.BlockSpec((tb, c_pad), lambda i: (i, 0))],
            out_specs=pl.BlockSpec((None, 1, tb), lambda i: (i, 0, 0)),
            compiler_params=pltpu.CompilerParams(
                dimension_semantics=("parallel",),
                vmem_limit_bytes=vmem_limit),
        )(pred, gt)
    else:
        nc = c_pad // tc
        out = pl.pallas_call(
            functools.partial(_ce_kernel_csplit, sub=sub),
            out_shape=out_shape,
            grid=(nb, nc),
            in_specs=[pl.BlockSpec((tb, tc), lambda i, j: (i, j)),
                      pl.BlockSpec((tb, tc), lambda i, j: (i, j))],
            out_specs=pl.BlockSpec((None, 1, tb), lambda i, j: (i, 0, 0)),
            scratch_shapes=[pltpu.VMEM((tb, 1), jnp.float32) for _ in range(4)],
            compiler_params=pltpu.CompilerParams(
                dimension_semantics=("parallel", "arbitrary"),
                vmem_limit_bytes=vmem_limit),
        )(pred, gt)
    return out.reshape(-1)[:n]


if __name__ == "__main__":
    key = jax.random.PRNGKey(0)

    def ref_loss(p, g):
        return -jnp.sum(jax.nn.log_softmax(p.astype(jnp.float32), axis=-1) * g, axis=1)

    # 1) Small shape matching the module's forward (batch=16, classes=32).
    k1, k2 = jax.random.split(key)
    pred = jax.random.normal(k1, (16, 32), dtype=jnp.float32)
    gt = jax.nn.softmax(jax.random.normal(k2, (16, 32), dtype=jnp.float32), axis=-1)
    out = cross_entropy_loss(pred, gt)
    jax.block_until_ready(out)
    assert out.shape == (16,)
    assert jnp.allclose(out, ref_loss(pred, gt), atol=1e-4, rtol=1e-3)

    # 2) Batch not a tile multiple, C not a lane multiple (single C block path).
    k3, k4 = jax.random.split(k1)
    pred2 = jax.random.normal(k3, (300, 160), dtype=jnp.float32)
    gt2 = jax.nn.softmax(jax.random.normal(k4, (300, 160), dtype=jnp.float32), axis=-1)
    out2 = cross_entropy_loss(pred2, gt2)
    jax.block_until_ready(out2)
    assert jnp.allclose(out2, ref_loss(pred2, gt2), atol=1e-4, rtol=1e-3)

    # 3) Force the C-split online-logsumexp path (3 C chunks, incl. a padded one).
    k5, k6 = jax.random.split(k3)
    pred3 = jax.random.normal(k5, (64, 320), dtype=jnp.float32)
    gt3 = jax.nn.softmax(jax.random.normal(k6, (64, 320), dtype=jnp.float32), axis=-1)
    out3 = cross_entropy_loss(pred3, gt3, tile_b=128, tile_c=128)
    jax.block_until_ready(out3)
    assert jnp.allclose(out3, ref_loss(pred3, gt3), atol=1e-4, rtol=1e-3)

    print("KERNEL_OK")
</pallas_src>

<mosaic_0001>
module attributes {stable_mosaic.version = 11 : i64} {
  func.func @_ce_kernel_1pass(%arg0: i32, %arg1: memref<128x32xf32, #tpu.memory_space<vmem>>, %arg2: memref<128x32xf32, #tpu.memory_space<vmem>>, %arg3: memref<1x1x128xf32, #tpu.memory_space<vmem>>) attributes {dimension_semantics = [#tpu.dimension_semantics<parallel>], iteration_bounds = array<i64: 1>, scalar_prefetch = 0 : i64, scratch_operands = 0 : i64, tpu.core_type = #tpu.core_type<tc>, window_params = [{transform_indices = @transform_0, window_bounds = array<i64: 128, 32>}, {transform_indices = @transform_1, window_bounds = array<i64: 128, 32>}, {transform_indices = @transform_2, window_bounds = array<i64: 1, 1, 128>}]} {
    %0 = tpu.iota {dimensions = array<i32: 0>} : vector<128x128xi32>
    %1 = tpu.iota {dimensions = array<i32: 1>} : vector<128x128xi32>
    %2 = arith.cmpi eq, %0, %1 : vector<128x128xi32>
    %3 = arith.extui %2 : vector<128x128xi1> to vector<128x128xi32>
    %4 = arith.sitofp %3 : vector<128x128xi32> to vector<128x128xf32>
    %c0 = arith.constant 0 : index
    %c0_0 = arith.constant 0 : index
    %5 = vector.load %arg1[%c0, %c0_0] : memref<128x32xf32, #tpu.memory_space<vmem>>, vector<128x32xf32>
    %c0_1 = arith.constant 0 : index
    %c0_2 = arith.constant 0 : index
    %6 = vector.load %arg2[%c0_1, %c0_2] : memref<128x32xf32, #tpu.memory_space<vmem>>, vector<128x32xf32>
    %cst = arith.constant dense<0xFF800000> : vector<128xf32>
    %7 = vector.multi_reduction <maximumf>, %5, %cst [1] : vector<128x32xf32> to vector<128xf32>
    %8 = vector.shape_cast %7 : vector<128xf32> to vector<128x1xf32>
    %9 = vector.broadcast %8 : vector<128x1xf32> to vector<128x32xf32>
    %10 = arith.subf %5, %9 : vector<128x32xf32>
    %11 = math.exp %10 : vector<128x32xf32>
    %cst_3 = arith.constant dense<0.000000e+00> : vector<128xf32>
    %12 = vector.multi_reduction <add>, %11, %cst_3 [1] : vector<128x32xf32> to vector<128xf32>
    %13 = vector.shape_cast %12 : vector<128xf32> to vector<128x1xf32>
    %cst_4 = arith.constant dense<0.000000e+00> : vector<128xf32>
    %14 = vector.multi_reduction <add>, %6, %cst_4 [1] : vector<128x32xf32> to vector<128xf32>
    %15 = vector.shape_cast %14 : vector<128xf32> to vector<128x1xf32>
    %16 = arith.mulf %5, %6 : vector<128x32xf32>
    %cst_5 = arith.constant dense<0.000000e+00> : vector<128xf32>
    %17 = vector.multi_reduction <add>, %16, %cst_5 [1] : vector<128x32xf32> to vector<128xf32>
    %18 = vector.shape_cast %17 : vector<128xf32> to vector<128x1xf32>
    %19 = math.log %13 : vector<128x1xf32>
    %20 = arith.addf %8, %19 : vector<128x1xf32>
    %21 = arith.mulf %20, %15 : vector<128x1xf32>
    %22 = arith.subf %21, %18 : vector<128x1xf32>
    %cst_6 = arith.constant dense<0.000000e+00> : vector<1x128xf32>
    %23 = tpu.matmul %22, %4, %cst_6 {dimension_numbers = #tpu.dot_dimension_numbers<[0], [0], [1], [1], [0, 1, 1, 1], [], []>} : vector<128x1xf32>, vector<128x128xf32>, vector<1x128xf32> -> vector<1x128xf32>
    %c0_7 = arith.constant 0 : index
    %c0_8 = arith.constant 0 : index
    %c0_9 = arith.constant 0 : index
    %24 = vector.load %arg3[%c0_7, %c0_8, %c0_9] : memref<1x1x128xf32, #tpu.memory_space<vmem>>, vector<1x1x128xf32>
    %25 = vector.shape_cast %24 : vector<1x1x128xf32> to vector<1x128xf32>
    %26 = vector.shape_cast %23 : vector<1x128xf32> to vector<1x1x128xf32>
    tpu.vector_store %arg3[%c0_7, %c0_8, %c0_9], %26 {strides = array<i32>} : memref<1x1x128xf32, #tpu.memory_space<vmem>>, vector<1x1x128xf32>,
    return
  }
  func.func @transform_0(%arg0: i32) -> (i32, i32) {
    %c0_i32 = arith.constant 0 : i32
    %c0_i32_0 = arith.constant 0 : i32
    return %arg0, %c0_i32 : i32, i32
  }
  func.func @transform_1(%arg0: i32) -> (i32, i32) {
    %c0_i32 = arith.constant 0 : i32
    %c0_i32_0 = arith.constant 0 : i32
    return %arg0, %c0_i32 : i32, i32
  }
  func.func @transform_2(%arg0: i32) -> (i32, i32, i32) {
    %c0_i32 = arith.constant 0 : i32
    %c0_i32_0 = arith.constant 0 : i32
    %c0_i32_1 = arith.constant 0 : i32
    return %arg0, %c0_i32, %c0_i32_0 : i32, i32, i32
  }
}

</mosaic_0001>

<bundles_post_ra>
// kernel: tpu_custom_call.1
= control target key start
LH: loop header
LB: loop body
LE: loop exit
PB: predicated region body
PF: predicated region fallthrough
CT: control target
= control target key end

     0   :  { %vm111_vm0 = vcmask 261120   ;;  %s1075_s0 = inlined_call_operand.vmem [shape: f32[128,32], index: 0, kind: input, shape index: {}]   ;;  %s1076_s1 = inlined_call_operand.vmem [shape: f32[128,32], index: 1, kind: input, shape index: {}]   ;;  %s1077_s2 = inlined_call_operand.hbm [shape: f32[1,1,128], index: 2, kind: output, shape index: {}]  }
   0x1   :  { %v664_v0 = vld [vmem:[%s1075_s0 + $0x10] sm:$0xff]  ;;  %v669_v1 = vld [vmem:[%s1075_s0] sm:$0xff]  ;;  %v685_v6 = vld [vmem:[%s1075_s0 + $0x8] sm:$0xff] }
   0x2   :  { %v674_v2 = vld [vmem:[%s1075_s0 + $0x20] sm:$0xff]  ;;  %v118_v3 = vsel %vm111_vm0, %v664_v0, -inf  ;;  %v112_v4 = vsel %vm111_vm0, %v669_v1, -inf  ;;  %v690_v7 = vld [vmem:[%s1075_s0 + $0x18] sm:$0xff]  ;;  %v695_v8 = vld [vmem:[%s1075_s0 + $0x28] sm:$0xff] }
   0x3   :  { %v124_v5 = vsel %vm111_vm0, %v674_v2, -inf  ;;  %119 = vmax.xlane.f32.xlu1 %v118_v3  ;;  %113 = vmax.xlane.f32.xlu0 %v112_v4 }
   0x4   :  { %125 = vmax.xlane.f32.xlu2 %v124_v5 }
   0x5   :  { %7 = vsyncpa [#allocation3], 0  ;;  %v115_v9 = vsel %vm111_vm0, %v685_v6, -inf  ;;  %v121_v10 = vsel %vm111_vm0, %v690_v7, -inf  ;;  %v127_v11 = vsel %vm111_vm0, %v695_v8, -inf  ;;  %v706_v12 = vld [vmem:[%s1075_s0 + $0x30] sm:$0xff] }
   0x6   :  { %v711_v13 = vld [vmem:[%s1075_s0 + $0x38] sm:$0xff]  ;;  %v716_v14 = vld [vmem:[%s1075_s0 + $0x40] sm:$0xff]  ;;  %v130_v15 = vsel %vm111_vm0, %v706_v12, -inf  ;;  %v727_v18 = vld [vmem:[%s1075_s0 + $0x50] sm:$0xff] }
   0x7   :  { %v133_v16 = vsel %vm111_vm0, %v711_v13, -inf  ;;  %v136_v17 = vsel %vm111_vm0, %v716_v14, -inf  ;;  %v732_v19 = vld [vmem:[%s1075_s0 + $0x48] sm:$0xff]  ;;  %v737_v20 = vld [vmem:[%s1075_s0 + $0x58] sm:$0xff]  ;;  %v142_v21 = vsel %vm111_vm0, %v727_v18, -inf  ;;  %v753_v25 = vld [vmem:[%s1075_s0 + $0x60] sm:$0xff] }
   0x8   :  { %v139_v22 = vsel %vm111_vm0, %v732_v19, -inf  ;;  %v145_v23 = vsel %vm111_vm0, %v737_v20, -inf  ;;  %v748_v24 = vld [vmem:[%s1075_s0 + $0x68] sm:$0xff]  ;;  %v758_v26 = vld [vmem:[%s1075_s0 + $0x70] sm:$0xff]  ;;  %v148_v28 = vsel %vm111_vm0, %v753_v25, -inf  ;;  %v95_v30 = vld [vmem:[%s1076_s1] sm:$0xff] }
   0x9   :  { %v151_v27 = vsel %vm111_vm0, %v748_v24, -inf  ;;  %v154_v29 = vsel %vm111_vm0, %v758_v26, -inf  ;;  %v304_v31 = vmul.f32 %v95_v30, %v669_v1  ;;  %v256_v33 = vsel %vm111_vm0, %v95_v30, 0.0  ;;  %v96_v34 = vld [vmem:[%s1076_s1 + $0x8] sm:$0xff]  ;;  %v778_v35 = vld [vmem:[%s1075_s0 + $0x78] sm:$0xff]  ;;  %v97_v40 = vld [vmem:[%s1076_s1 + $0x10] sm:$0xff] }
   0xa   :  { %v305_v36 = vmul.f32 %v96_v34, %v685_v6  ;;  %v157_v37 = vsel %vm111_vm0, %v778_v35, -inf  ;;  %v259_v39 = vsel %vm111_vm0, %v96_v34, 0.0  ;;  %v306_v41 = vmul.f32 %v97_v40, %v664_v0  ;;  %v98_v44 = vld [vmem:[%s1076_s1 + $0x18] sm:$0xff]  ;;  %v99_v48 = vld [vmem:[%s1076_s1 + $0x20] sm:$0xff]  ;;  %v100_v52 = vld [vmem:[%s1076_s1 + $0x28] sm:$0xff]  ;;  %s508_s0 = sshll.u32 %s1077_s2, 4  ;;  %s509_s0 = int_to_ptr.hbm [resolvable:$true] %s508_s0 }
   0xb   :  { %116 = vmax.xlane.f32.xlu0 %v115_v9  ;;  %122 = vmax.xlane.f32.xlu1 %v121_v10  ;;  %v320_v32 = vsel %vm111_vm0, %v304_v31, 0.0  ;;  %v262_v43 = vsel %vm111_vm0, %v97_v40, 0.0  ;;  %v307_v45 = vmul.f32 %v98_v44, %v690_v7  ;;  %v265_v47 = vsel %vm111_vm0, %v98_v44, 0.0  ;;  %v101_v56 = vld [vmem:[%s1076_s1 + $0x30] sm:$0xff]  ;;  %v102_v59 = vld [vmem:[%s1076_s1 + $0x38] sm:$0xff]  ;;  %v103_v30 = vld [vmem:[%s1076_s1 + $0x40] sm:$0xff] }
   0xc   :  { %128 = vmax.xlane.f32.xlu2 %v127_v11  ;;  %v323_v38 = vsel %vm111_vm0, %v305_v36, 0.0  ;;  %v326_v42 = vsel %vm111_vm0, %v306_v41, 0.0  ;;  %v308_v49 = vmul.f32 %v99_v48, %v674_v2  ;;  %v268_v51 = vsel %vm111_vm0, %v99_v48, 0.0  ;;  %v104_v41 = vld [vmem:[%s1076_s1 + $0x48] sm:$0xff] }
   0xd   :  { %v329_v46 = vsel %vm111_vm0, %v307_v45, 0.0  ;;  %v309_v53 = vmul.f32 %v100_v52, %v695_v8  ;;  %v271_v55 = vsel %vm111_vm0, %v100_v52, 0.0  ;;  %v310_v57 = vmul.f32 %v101_v56, %v706_v12 }
   0xe   :  { %v332_v50 = vsel %vm111_vm0, %v308_v49, 0.0  ;;  %v274_v60 = vsel %vm111_vm0, %v101_v56, 0.0  ;;  %v311_v61 = vmul.f32 %v102_v59, %v711_v13  ;;  %v277_v63 = vsel %vm111_vm0, %v102_v59, 0.0 }
   0xf   :  { %v335_v54 = vsel %vm111_vm0, %v309_v53, 0.0  ;;  %v338_v58 = vsel %vm111_vm0, %v310_v57, 0.0  ;;  %v313_v45 = vmul.f32 %v104_v41, %v732_v19  ;;  %v105_v57 = vld [vmem:[%s1076_s1 + $0x50] sm:$0xff]  ;;  %v283_v59 = vsel %vm111_vm0, %v104_v41, 0.0 }
  0x10   :  { %v341_v62 = vsel %vm111_vm0, %v311_v61, 0.0 }
  0x13   :  { %131 = vmax.xlane.f32.xlu0 %v130_v15  ;;  %134 = vmax.xlane.f32.xlu1 %v133_v16 }
  0x14   :  { %137 = vmax.xlane.f32.xlu2 %v136_v17 }
  0x1b   :  { %143 = vmax.xlane.f32.xlu1 %v142_v21  ;;  %140 = vmax.xlane.f32.xlu0 %v139_v22 }
  0x1c   :  { %146 = vmax.xlane.f32.xlu2 %v145_v23 }
  0x23   :  { %152 = vmax.xlane.f32.xlu1 %v151_v27  ;;  %149 = vmax.xlane.f32.xlu0 %v148_v28 }
  0x24   :  { %155 = vmax.xlane.f32.xlu2 %v154_v29 }
  0x2b   :  { %321 = vadd.xlane.f32.xlu1 %v320_v32  ;;  %158 = vmax.xlane.f32.xlu0 %v157_v37 }
  0x2c   :  { %257 = vadd.xlane.f32.xlu2 %v256_v33 }
  0x33   :  { %324 = vadd.xlane.f32.xlu1 %v323_v38 }
  0x34   :  { %260 = vadd.xlane.f32.xlu2 %v259_v39 }
  0x3b   :  { %327 = vadd.xlane.f32.xlu1 %v326_v42 }
  0x3c   :  { %263 = vadd.xlane.f32.xlu2 %v262_v43 }
  0x43   :  { %330 = vadd.xlane.f32.xlu1 %v329_v46 }
  0x44   :  { %266 = vadd.xlane.f32.xlu2 %v265_v47  ;;  %v347_v47 = vsel %vm111_vm0, %v313_v45, 0.0 }
  0x4b   :  { %333 = vadd.xlane.f32.xlu1 %v332_v50 }
  0x4c   :  { %269 = vadd.xlane.f32.xlu2 %v268_v51  ;;  %v280_v51 = vsel %vm111_vm0, %v103_v30, 0.0 }
  0x53   :  { %336 = vadd.xlane.f32.xlu1 %v335_v54 }
  0x54   :  { %272 = vadd.xlane.f32.xlu2 %v271_v55 }
  0x5b   :  { %339 = vadd.xlane.f32.xlu1 %v338_v58 }
  0x5c   :  { %275 = vadd.xlane.f32.xlu2 %v274_v60 }
  0x63   :  { %342 = vadd.xlane.f32.xlu1 %v341_v62  ;;  %v314_v62 = vmul.f32 %v105_v57, %v727_v18 }
  0x64   :  { %278 = vadd.xlane.f32.xlu2 %v277_v63 }
  0x76   :  { %v821_v3 = vpop.xlane.xlu1 %119  ;;  %v823_v4 = vpop.xlane.xlu0 %113 }
  0x77   :  { %v162_v5 = vsub.f32 %v664_v0, %v821_v3  ;;  %v160_v9 = vsub.f32 %v669_v1, %v823_v4  ;;  %v829_v10 = vpop.xlane.xlu2 %125 }
  0x78   :  { %v164_v11 = vsub.f32 %v674_v2, %v829_v10 }
  0x79   :  { %v180_v15 = vmul.f32 1.442695, %v162_v5  ;;  %v176_v16 = vmul.f32 1.442695, %v160_v9  ;;  %v350_v9 = vsel %vm111_vm0, %v314_v62, 0.0 }
  0x7a   :  { %v184_v17 = vmul.f32 1.442695, %v164_v11  ;;  %v106_v11 = vld [vmem:[%s1076_s1 + $0x58] sm:$0xff] }
  0x7b   :  { %554 = vpow2.f32 %v180_v15 }
  0x7c   :  { %556 = vpow2.f32 %v176_v16  ;;  %v286_v16 = vsel %vm111_vm0, %v105_v57, 0.0 }
  0x7d   :  { %558 = vpow2.f32 %v184_v17 }
  0x7e   :  { %v833_v21 = vpop.xlane.xlu0 %116  ;;  %v841_v28 = vpop.xlane.xlu1 %122 }
  0x7f   :  { %v161_v22 = vsub.f32 %v685_v6, %v833_v21  ;;  %v837_v0 = vpop.xlane.xlu2 %128  ;;  %v163_v37 = vsub.f32 %v690_v7, %v841_v28 }
  0x80   :  { %v165_v1 = vsub.f32 %v695_v8, %v837_v0  ;;  %v312_v8 = vmul.f32 %v103_v30, %v716_v14 }
  0x81   :  { %v555_v23 = vpop.eup %554  ;;  %v178_v27 = vmul.f32 1.442695, %v161_v22 }
  0x82   :  { %v557_v2 = vpop.eup %556  ;;  %v214_v29 = vsel %vm111_vm0, %v555_v23, 0.0  ;;  %v186_v31 = vmul.f32 1.442695, %v165_v1  ;;  %v344_v39 = vsel %vm111_vm0, %v312_v8, 0.0  ;;  %v315_v1 = vmul.f32 %v106_v11, %v737_v20 }
  0x83   :  { %560 = vpow2.f32 %v178_v27  ;;  %215 = vadd.xlane.f32.xlu0 %v214_v29  ;;  %v208_v6 = vsel %vm111_vm0, %v557_v2, 0.0  ;;  %v559_v32 = vpop.eup %558  ;;  %v289_v29 = vsel %vm111_vm0, %v106_v11, 0.0 }
  0x84   :  { %209 = vadd.xlane.f32.xlu1 %v208_v6  ;;  %562 = vpow2.f32 %v186_v31  ;;  %v220_v36 = vsel %vm111_vm0, %v559_v32, 0.0  ;;  %v353_v2 = vsel %vm111_vm0, %v315_v1, 0.0  ;;  %v108_v32 = vld [vmem:[%s1076_s1 + $0x68] sm:$0xff] }
  0x86   :  { %v849_v33 = vpop.xlane.xlu0 %131  ;;  %v861_v43 = vpop.xlane.xlu1 %134 }
  0x87   :  { %v166_v34 = vsub.f32 %v706_v12, %v849_v33  ;;  %v182_v12 = vmul.f32 1.442695, %v163_v37  ;;  %v167_v7 = vsub.f32 %v711_v13, %v861_v43  ;;  %v868_v48 = vpop.xlane.xlu2 %137  ;;  %v920_v37 = vld [vmem:[%s1076_s1 + $0x70] sm:$0xff] }
  0x88   :  { %v168_v13 = vsub.f32 %v716_v14, %v868_v48  ;;  %v318_v41 = vmul.f32 %v920_v37, %v758_v26 }
  0x89   :  { %v561_v38 = vpop.eup %560  ;;  %v188_v42 = vmul.f32 1.442695, %v166_v34  ;;  %v190_v49 = vmul.f32 1.442695, %v167_v7 }
  0x8a   :  { %v211_v40 = vsel %vm111_vm0, %v561_v38, 0.0  ;;  %v563_v44 = vpop.eup %562  ;;  %v192_v58 = vmul.f32 1.442695, %v168_v13  ;;  %v107_v38 = vld [vmem:[%s1076_s1 + $0x60] sm:$0xff]  ;;  %v362_v45 = vsel %vm111_vm0, %v318_v41, 0.0 }
  0x8b   :  { %221 = vadd.xlane.f32.xlu0 %v220_v36  ;;  %212 = vadd.xlane.f32.xlu2 %v211_v40  ;;  %564 = vpow2.f32 %v188_v42  ;;  %v223_v46 = vsel %vm111_vm0, %v563_v44, 0.0  ;;  %v295_v36 = vsel %vm111_vm0, %v108_v32, 0.0  ;;  %v292_v40 = vsel %vm111_vm0, %v107_v38, 0.0 }
  0x8c   :  { %345 = vadd.xlane.f32.xlu1 %v344_v39  ;;  %566 = vpow2.f32 %v182_v12 }
  0x8d   :  { %568 = vpow2.f32 %v190_v49  ;;  %v317_v49 = vmul.f32 %v108_v32, %v748_v24 }
  0x8e   :  { %v870_v50 = vpop.xlane.xlu1 %143  ;;  %v883_v60 = vpop.xlane.xlu0 %140  ;;  %570 = vpow2.f32 %v192_v58 }
  0x8f   :  { %v877_v56 = vpop.xlane.xlu2 %146  ;;  %v169_v63 = vsub.f32 %v732_v19, %v883_v60  ;;  %v170_v27 = vsub.f32 %v727_v18, %v870_v50 }
  0x90   :  { %v171_v18 = vsub.f32 %v737_v20, %v877_v56 }
  0x91   :  { %v565_v52 = vpop.eup %564  ;;  %v194_v15 = vmul.f32 1.442695, %v169_v63  ;;  %v196_v6 = vmul.f32 1.442695, %v170_v27 }
  0x92   :  { %v567_v53 = vpop.eup %566  ;;  %v226_v54 = vsel %vm111_vm0, %v565_v52, 0.0  ;;  %v198_v20 = vmul.f32 1.442695, %v171_v18 }
  0x93   :  { %224 = vadd.xlane.f32.xlu0 %v223_v46  ;;  %281 = vadd.xlane.f32.xlu2 %v280_v51  ;;  %v217_v55 = vsel %vm111_vm0, %v567_v53, 0.0  ;;  %v569_v61 = vpop.eup %568  ;;  %572 = vpow2.f32 %v194_v15  ;;  %v359_v51 = vsel %vm111_vm0, %v317_v49, 0.0 }
  0x94   :  { %348 = vadd.xlane.f32.xlu1 %v347_v47  ;;  %v229_v5 = vsel %vm111_vm0, %v569_v61, 0.0  ;;  %v571_v22 = vpop.eup %570  ;;  %574 = vpow2.f32 %v196_v6 }
  0x95   :  { %v232_v23 = vsel %vm111_vm0, %v571_v22, 0.0  ;;  %576 = vpow2.f32 %v198_v20  ;;  %v298_v20 = vsel %vm111_vm0, %v920_v37, 0.0 }
  0x96   :  { %v885_v14 = vpop.xlane.xlu1 %152  ;;  %v925_v39 = vpop.xlane.xlu0 %149 }
  0x97   :  { %v896_v17 = vpop.xlane.xlu2 %155  ;;  %v172_v12 = vsub.f32 %v753_v25, %v925_v39  ;;  %v173_v53 = vsub.f32 %v748_v24, %v885_v14  ;;  %v110_v24 = vld [vmem:[%s1076_s1 + $0x78] sm:$0xff]  ;;  %s645_s1 = smov [#allocation2]  }
  0x98   :  { %v174_v61 = vsub.f32 %v758_v26, %v896_v17  ;;  %s506_s16 = sshll.u32 %s645_s1, 4  ;;  %s507_s16 = int_to_ptr.vmem [resolvable:$true] %s506_s16 }
  0x99   :  { %v573_v30 = vpop.eup %572  ;;  %v200_v46 = vmul.f32 1.442695, %v172_v12  ;;  %v202_v57 = vmul.f32 1.442695, %v173_v53 }
  0x9a   :  { %v235_v8 = vsel %vm111_vm0, %v573_v30, 0.0  ;;  %v575_v42 = vpop.eup %574 }
  0x9b   :  { %227 = vadd.xlane.f32.xlu0 %v226_v54  ;;  %284 = vadd.xlane.f32.xlu2 %v283_v59  ;;  %v238_v7 = vsel %vm111_vm0, %v575_v42, 0.0  ;;  %v577_v52 = vpop.eup %576  ;;  %578 = vpow2.f32 %v200_v46  ;;  %v319_v42 = vmul.f32 %v110_v24, %v778_v35 }
  0x9c   :  { %218 = vadd.xlane.f32.xlu1 %v217_v55  ;;  %v241_v13 = vsel %vm111_vm0, %v577_v52, 0.0  ;;  %580 = vpow2.f32 %v202_v57 }
  0x9e   :  { %v899_v19 = vpop.xlane.xlu1 %321  ;;  %v955_v63 = vpop.xlane.xlu0 %158 }
  0x9f   :  { %v906_v31 = vpop.xlane.xlu2 %257 }
  0xa1   :  { %v579_v55 = vpop.eup %578 }
  0xa2   :  { %v244_v59 = vsel %vm111_vm0, %v579_v55, 0.0  ;;  %v581_v11 = vpop.eup %580 }
  0xa3   :  { %230 = vadd.xlane.f32.xlu0 %v229_v5  ;;  %287 = vadd.xlane.f32.xlu2 %v286_v16  ;;  %v301_v5 = vsel %vm111_vm0, %v110_v24, 0.0  ;;  %v175_v16 = vsub.f32 %v778_v35, %v955_v63  ;;  %v247_v26 = vsel %vm111_vm0, %v581_v11, 0.0 }
  0xa4   :  { %351 = vadd.xlane.f32.xlu1 %v350_v9  ;;  %v204_v9 = vmul.f32 1.442695, %v174_v61 }
  0xa5   :  { %v206_v22 = vmul.f32 1.442695, %v175_v16 }
  0xa6   :  { %v914_v34 = vpop.xlane.xlu1 %324  ;;  %582 = vpow2.f32 %v204_v9 }
  0xa7   :  { %v932_v44 = vpop.xlane.xlu2 %260  ;;  %584 = vpow2.f32 %v206_v22 }
  0xab   :  { %233 = vadd.xlane.f32.xlu0 %v232_v23  ;;  %290 = vadd.xlane.f32.xlu2 %v289_v29 }
  0xac   :  { %354 = vadd.xlane.f32.xlu1 %v353_v2  ;;  %v583_v23 = vpop.eup %582 }
  0xad   :  { %v250_v2 = vsel %vm111_vm0, %v583_v23, 0.0  ;;  %v585_v29 = vpop.eup %584 }
  0xae   :  { %v936_v47 = vpop.xlane.xlu1 %327  ;;  %v253_v30 = vsel %vm111_vm0, %v585_v29, 0.0 }
  0xaf   :  { %v943_v54 = vpop.xlane.xlu2 %263 }
  0xb3   :  { %236 = vadd.xlane.f32.xlu0 %v235_v8  ;;  %293 = vadd.xlane.f32.xlu2 %v292_v40  ;;  %v316_v8 = vmul.f32 %v107_v38, %v753_v25 }
  0xb4   :  { %296 = vadd.xlane.f32.xlu1 %v295_v36 }
  0xb5   :  { %v356_v18 = vsel %vm111_vm0, %v316_v8, 0.0 }
  0xb6   :  { %v945_v58 = vpop.xlane.xlu1 %330 }
  0xb7   :  { %v953_v62 = vpop.xlane.xlu2 %266 }
  0xbb   :  { %239 = vadd.xlane.f32.xlu0 %v238_v7  ;;  %360 = vadd.xlane.f32.xlu2 %v359_v51  ;;  %v365_v7 = vsel %vm111_vm0, %v319_v42, 0.0 }
  0xbc   :  { %363 = vadd.xlane.f32.xlu1 %v362_v45 }
  0xbe   :  { %v958_v15 = vpop.xlane.xlu1 %333 }
  0xbf   :  { %v963_v1 = vpop.xlane.xlu2 %269 }
  0xc3   :  { %242 = vadd.xlane.f32.xlu0 %v241_v13  ;;  %302 = vadd.xlane.f32.xlu2 %v301_v5 }
  0xc6   :  { %v965_v27 = vpop.xlane.xlu1 %336 }
  0xc7   :  { %v969_v6 = vpop.xlane.xlu2 %272 }
  0xcb   :  { %245 = vadd.xlane.f32.xlu0 %v244_v59 }
  0xce   :  { %v971_v32 = vpop.xlane.xlu1 %339 }
  0xcf   :  { %v975_v36 = vpop.xlane.xlu2 %275 }
  0xd3   :  { %248 = vadd.xlane.f32.xlu0 %v247_v26 }
  0xd6   :  { %v977_v40 = vpop.xlane.xlu1 %342 }
  0xd7   :  { %v279_v41 = vpop.xlane.xlu2 %278 }
  0xdb   :  { %251 = vadd.xlane.f32.xlu0 %v250_v2 }
  0xe3   :  { %254 = vadd.xlane.f32.xlu0 %v253_v30 }
  0xeb   :  { %357 = vadd.xlane.f32.xlu0 %v356_v18 }
  0xf3   :  { %299 = vadd.xlane.f32.xlu0 %v298_v20 }
  0xf6   :  { %v216_v12 = vpop.xlane.xlu0 %215 }
  0xf7   :  { %v210_v45 = vpop.xlane.xlu1 %209 }
  0xf8   :  { %586 = vlog2.f32 %v210_v45 }
  0xfb   :  { %366 = vadd.xlane.f32.xlu0 %v365_v7 }
  0xfe   :  { %v587_v25 = vpop.eup %586  ;;  %v213_v38 = vpop.xlane.xlu2 %212 }
  0xff   :  { %v222_v46 = vpop.xlane.xlu0 %221  ;;  %v369_v49 = vmul.f32 0.6931472, %v587_v25  ;;  %v983_v51 = vpop.xlane.xlu1 %345  ;;  %588 = vlog2.f32 %v213_v38 }
 0x100   :  { %590 = vlog2.f32 %v216_v12 }
 0x101   :  { %v400_v37 = vadd.f32 %v369_v49, %v823_v4  ;;  %592 = vlog2.f32 %v222_v46 }
 0x103   :  { %v416_v52 = vmul.f32 %v400_v37, %v906_v31 }
 0x105   :  { %v589_v53 = vpop.eup %588  ;;  %v432_v35 = vsub.f32 %v416_v52, %v899_v19 }
 0x106   :  { %v591_v13 = vpop.eup %590  ;;  %v371_v55 = vmul.f32 0.6931472, %v589_v53 }
 0x107   :  { %v225_v57 = vpop.xlane.xlu0 %224  ;;  %448 = vxpose.xlu1.b32.start [1/16] (narrow) %v432_v35, 8  ;;  %v988_v59 = vpop.xlane.xlu1 %348  ;;  %v373_v24 = vmul.f32 0.6931472, %v591_v13 }
 0x108   :  { %v401_v61 = vadd.f32 %v371_v55, %v833_v21  ;;  %v593_v16 = vpop.eup %592 }
 0x109   :  { %v402_v4 = vadd.f32 %v373_v24, %v821_v3 }
 0x10a   :  { %v417_v5 = vmul.f32 %v401_v61, %v932_v44  ;;  %v377_v44 = vmul.f32 0.6931472, %v593_v16 }
 0x10b   :  { %v418_v19 = vmul.f32 %v402_v4, %v943_v54 }
 0x10c   :  { %v433_v9 = vsub.f32 %v417_v5, %v914_v34  ;;  %v404_v29 = vadd.f32 %v377_v44, %v829_v10 }
 0x10d   :  { %v434_v26 = vsub.f32 %v418_v19, %v936_v47 }
 0x10e   :  { %v420_v42 = vmul.f32 %v404_v29, %v963_v1 }
 0x10f   :  { %v228_v11 = vpop.xlane.xlu0 %227  ;;  %v219_v31 = vpop.xlane.xlu1 %218  ;;  %449 = vxpose.xlu1.b32.cont [2/16] (narrow) %v433_v9, 8 }
 0x110   :  { %594 = vlog2.f32 %v219_v31  ;;  %v436_v45 = vsub.f32 %v420_v42, %v958_v15  ;;  %v282_v15 = vpop.xlane.xlu2 %281 }
 0x116   :  { %v595_v22 = vpop.eup %594 }
 0x117   :  { %v231_v23 = vpop.xlane.xlu0 %230  ;;  %v375_v21 = vmul.f32 0.6931472, %v595_v22  ;;  %450 = vxpose.xlu1.b32.cont [3/16] (narrow) %v434_v26, 8 }
 0x118   :  { %596 = vlog2.f32 %v231_v23  ;;  %v285_v53 = vpop.xlane.xlu2 %284 }
 0x119   :  { %598 = vlog2.f32 %v225_v57  ;;  %v403_v34 = vadd.f32 %v375_v21, %v841_v28 }
 0x11a   :  { %600 = vlog2.f32 %v228_v11 }
 0x11b   :  { %v419_v3 = vmul.f32 %v403_v34, %v953_v62 }
 0x11d   :  { %v435_v30 = vsub.f32 %v419_v3, %v945_v58  ;;  %v12_v3 = vlaneseq }
 0x11e   :  { %v597_v2 = vpop.eup %596 }
 0x11f   :  { %v599_v54 = vpop.eup %598  ;;  %v383_v8 = vmul.f32 0.6931472, %v597_v2  ;;  %v234_v18 = vpop.xlane.xlu0 %233  ;;  %451 = vxpose.xlu1.b32.cont [4/16] (narrow) %v435_v30, 8  ;;  %v1017_v29 = vshrl.u32 %v12_v3, 7  ;;  %v1019_v30 = vand.u32 127, %v12_v3 }
 0x120   :  { %v379_v20 = vmul.f32 0.6931472, %v599_v54  ;;  %v601_v10 = vpop.eup %600  ;;  %602 = vlog2.f32 %v234_v18  ;;  %v288_v61 = vpop.xlane.xlu2 %287 }
 0x121   :  { %v407_v47 = vadd.f32 %v383_v8, %v861_v43  ;;  %v381_v58 = vmul.f32 0.6931472, %v601_v10  ;;  %v28_v8 = vadd.s32 120, %v1017_v29  ;;  %v27_v18 = vadd.s32 112, %v1017_v29 }
 0x122   :  { %v405_v62 = vadd.f32 %v379_v20, %v837_v0  ;;  %v25_v42 = vadd.s32 96, %v1017_v29  ;;  %v23_v10 = vadd.s32 80, %v1017_v29  ;;  %vm31_vm0 = vcmp.eq.s32.totalorder %v1017_v29, %v1019_v30 }
 0x123   :  { %v423_v12 = vmul.f32 %v407_v47, %v279_v41  ;;  %v406_v38 = vadd.f32 %v381_v58, %v849_v33  ;;  %v26_v47 = vadd.s32 104, %v1017_v29  ;;  %vm46_vm1 = vcmp.eq.s32.totalorder %v28_v8, %v1019_v30 }
 0x124   :  { %v421_v25 = vmul.f32 %v405_v62, %v969_v6  ;;  %vm45_vm2 = vcmp.eq.s32.totalorder %v27_v18, %v1019_v30  ;;  %vm43_vm4 = vcmp.eq.s32.totalorder %v25_v42, %v1019_v30  ;;  %vm41_vm6 = vcmp.eq.s32.totalorder %v23_v10, %v1019_v30 }
 0x125   :  { %v439_v28 = vsub.f32 %v423_v12, %v977_v40  ;;  %v422_v1 = vmul.f32 %v406_v38, %v975_v36  ;;  %v644_v12 = vmov 1.0   ;;  %vm44_vm3 = vcmp.eq.s32.totalorder %v26_v47, %v1019_v30 }
 0x126   :  { %v437_v43 = vsub.f32 %v421_v25, %v965_v27  ;;  %v603_v0 = vpop.eup %602  ;;  %533 = vmatpush.msk.msra.mxu0 %vm46_vm1, %v644_v12  ;;  %v22_v25 = vadd.s32 72, %v1017_v29 }
 0x127   :  { %v237_v7 = vpop.xlane.xlu0 %236  ;;  %452 = vxpose.xlu1.b32.cont [5/16] (narrow) %v436_v45, 8  ;;  %v438_v40 = vsub.f32 %v422_v1, %v971_v32  ;;  %v385_v49 = vmul.f32 0.6931472, %v603_v0 }
 0x128   :  { %604 = vlog2.f32 %v237_v7  ;;  %534 = vmatpush.msk.msra.mxu0 %vm45_vm2, %v644_v12  ;;  %vm40_vm7 = vcmp.eq.s32.totalorder %v22_v25, %v1019_v30 }
 0x129   :  { %v408_v37 = vadd.f32 %v385_v49, %v868_v48 }
 0x12a   :  { %535 = vmatpush.msk.msra.mxu0 %vm44_vm3, %v644_v12 }
 0x12b   :  { %v424_v27 = vmul.f32 %v408_v37, %v282_v15  ;;  %v19_v15 = vadd.s32 48, %v1017_v29 }
 0x12c   :  { %536 = vmatpush.msk.msra.mxu0 %vm43_vm4, %v644_v12 }
 0x12d   :  { %v440_v35 = vsub.f32 %v424_v27, %v983_v51  ;;  %v352_v51 = vpop.xlane.xlu1 %351  ;;  %vm37_vm10 = vcmp.eq.s32.totalorder %v19_v15, %v1019_v30  ;;  %v16_v27 = vadd.s32 24, %v1017_v29 }
 0x12e   :  { %v605_v6 = vpop.eup %604 }
 0x12f   :  { %v240_v46 = vpop.xlane.xlu0 %239  ;;  %453 = vxpose.xlu1.b32.cont [6/16] (narrow) %v437_v43, 8  ;;  %v387_v33 = vmul.f32 0.6931472, %v605_v6  ;;  %v21_v43 = vadd.s32 64, %v1017_v29  ;;  %vm34_vm13 = vcmp.eq.s32.totalorder %v16_v27, %v1019_v30 }
 0x130   :  { %606 = vlog2.f32 %v240_v46 }
 0x131   :  { %v409_v36 = vadd.f32 %v387_v33, %v883_v60  ;;  %v291_v60 = vpop.xlane.xlu2 %290  ;;  %vm39_vm8 = vcmp.eq.s32.totalorder %v21_v43, %v1019_v30 }
 0x133   :  { %v425_v57 = vmul.f32 %v409_v36, %v285_v53 }
 0x135   :  { %v441_v48 = vsub.f32 %v425_v57, %v988_v59  ;;  %v355_v59 = vpop.xlane.xlu1 %354 }
 0x136   :  { %v607_v32 = vpop.eup %606 }
 0x137   :  { %v243_v41 = vpop.xlane.xlu0 %242  ;;  %454 = vxpose.xlu1.b32.cont [7/16] (narrow) %v438_v40, 8  ;;  %v389_v55 = vmul.f32 0.6931472, %v607_v32  ;;  %v20_v40 = vadd.s32 56, %v1017_v29 }
 0x138   :  { %608 = vlog2.f32 %v243_v41 }
 0x139   :  { %v410_v24 = vadd.f32 %v389_v55, %v870_v50  ;;  %v294_v34 = vpop.xlane.xlu2 %293  ;;  %vm38_vm9 = vcmp.eq.s32.totalorder %v20_v40, %v1019_v30 }
 0x13b   :  { %v426_v11 = vmul.f32 %v410_v24, %v288_v61 }
 0x13d   :  { %v442_v31 = vsub.f32 %v426_v11, %v352_v51  ;;  %v297_v45 = vpop.xlane.xlu1 %296 }
 0x13e   :  { %v609_v5 = vpop.eup %608 }
 0x13f   :  { %v246_v52 = vpop.xlane.xlu0 %245  ;;  %455 = vxpose.xlu1.b32.cont [8/16] (narrow) %v439_v28, 8  ;;  %v391_v4 = vmul.f32 0.6931472, %v609_v5  ;;  %v24_v28 = vadd.s32 88, %v1017_v29 }
 0x140   :  { %610 = vlog2.f32 %v246_v52  ;;  %v17_v52 = vadd.s32 32, %v1017_v29 }
 0x141   :  { %v411_v19 = vadd.f32 %v391_v4, %v877_v56  ;;  %v361_v7 = vpop.xlane.xlu2 %360  ;;  %vm42_vm5 = vcmp.eq.s32.totalorder %v24_v28, %v1019_v30 }
 0x142   :  { %537 = vmatpush.msk.msra.mxu0 %vm42_vm5, %v644_v12  ;;  %vm35_vm12 = vcmp.eq.s32.totalorder %v17_v52, %v1019_v30 }
 0x143   :  { %v427_v22 = vmul.f32 %v411_v19, %v291_v60 }
 0x144   :  { %538 = vmatpush.msk.msra.mxu0 %vm41_vm6, %v644_v12 }
 0x145   :  { %v443_v50 = vsub.f32 %v427_v22, %v355_v59  ;;  %v364_v37 = vpop.xlane.xlu1 %363 }
 0x146   :  { %v611_v16 = vpop.eup %610  ;;  %539 = vmatpush.msk.msra.mxu0 %vm40_vm7, %v644_v12 }
 0x147   :  { %v249_v13 = vpop.xlane.xlu0 %248  ;;  %456 = vxpose.xlu1.b32.cont [9/16] (narrow) %v440_v35, 8  ;;  %v393_v23 = vmul.f32 0.6931472, %v611_v16  ;;  %v15_v35 = vadd.s32 16, %v1017_v29 }
 0x148   :  { %612 = vlog2.f32 %v249_v13  ;;  %540 = vmatpush.msk.msra.mxu0 %vm39_vm8, %v644_v12 }
 0x149   :  { %v412_v44 = vadd.f32 %v393_v23, %v925_v39  ;;  %v303_v53 = vpop.xlane.xlu2 %302  ;;  %vm33_vm14 = vcmp.eq.s32.totalorder %v15_v35, %v1019_v30 }
 0x14a   :  { %541 = vmatpush.msk.msra.mxu0 %vm38_vm9, %v644_v12 }
 0x14b   :  { %v428_v56 = vmul.f32 %v412_v44, %v294_v34 }
 0x14c   :  { %542 = vmatpush.msk.msra.mxu0 %vm37_vm10, %v644_v12 }
 0x14e   :  { %v613_v21 = vpop.eup %612 }
 0x14f   :  { %v252_v9 = vpop.xlane.xlu0 %251  ;;  %457 = vxpose.xlu1.b32.cont [10/16] (narrow) %v441_v48, 8  ;;  %v395_v2 = vmul.f32 0.6931472, %v613_v21 }
 0x150   :  { %614 = vlog2.f32 %v252_v9 }
 0x151   :  { %v413_v20 = vadd.f32 %v395_v2, %v885_v14 }
 0x153   :  { %v429_v14 = vmul.f32 %v413_v20, %v297_v45 }
 0x155   :  { %v445_v38 = vsub.f32 %v429_v14, %v361_v7 }
 0x156   :  { %v615_v62 = vpop.eup %614 }
 0x157   :  { %458 = vxpose.xlu1.b32.cont [11/16] (narrow) %v442_v31, 8  ;;  %v255_v26 = vpop.xlane.xlu0 %254  ;;  %v397_v58 = vmul.f32 0.6931472, %v615_v62 }
 0x158   :  { %616 = vlog2.f32 %v255_v26 }
 0x159   :  { %v414_v1 = vadd.f32 %v397_v58, %v896_v17  ;;  %v18_v17 = vadd.s32 40, %v1017_v29 }
 0x15b   :  { %vm36_vm11 = vcmp.eq.s32.totalorder %v18_v17, %v1019_v30 }
 0x15c   :  { %543 = vmatpush.msk.msra.mxu0 %vm36_vm11, %v644_v12 }
 0x15e   :  { %v617_v0 = vpop.eup %616  ;;  %544 = vmatpush.msk.msra.mxu0 %vm35_vm12, %v644_v12 }
 0x15f   :  { %459 = vxpose.xlu1.b32.cont [12/16] (narrow) %v443_v50, 8  ;;  %v358_v54 = vpop.xlane.xlu0 %357  ;;  %v399_v49 = vmul.f32 0.6931472, %v617_v0 }
 0x160   :  { %v444_v39 = vsub.f32 %v428_v56, %v358_v54  ;;  %545 = vmatpush.msk.msra.mxu0 %vm34_vm13, %v644_v12 }
 0x161   :  { %v415_v33 = vadd.f32 %v399_v49, %v955_v63  ;;  %v14_v63 = vadd.s32 8, %v1017_v29 }
 0x162   :  { %546 = vmatpush.msk.msra.mxu0 %vm33_vm14, %v644_v12 }
 0x163   :  { %v431_v32 = vmul.f32 %v415_v33, %v303_v53  ;;  %vm32_vm15 = vcmp.eq.s32.totalorder %v14_v63, %v1019_v30 }
 0x164   :  { %547 = vmatpush.msk.msra.mxu0 %vm32_vm15, %v644_v12 }
 0x166   :  { %548 = vmatpush.msk.msra.mxu0 %vm31_vm0, %v644_v12 }
 0x167   :  { %460 = vxpose.xlu1.b32.cont [13/16] (narrow) %v444_v39, 8  ;;  %v300_v46 = vpop.xlane.xlu0 %299 }
 0x168   :  { %v430_v41 = vmul.f32 %v414_v1, %v300_v46 }
 0x16a   :  { %v446_v6 = vsub.f32 %v430_v41, %v364_v37 }
 0x16f   :  { %461 = vxpose.xlu1.b32.cont [14/16] (narrow) %v445_v38, 8  ;;  %v367_v36 = vpop.xlane.xlu0 %366 }
 0x170   :  { %v447_v13 = vsub.f32 %v431_v32, %v367_v36 }
 0x177   :  { %462 = vxpose.xlu1.b32.cont [15/16] (narrow) %v446_v6, 8 }
 0x17f   :  { %463 = vxpose.xlu1.b32.end [16/16] (narrow) %v447_v13, 8 }
 0x1ab   :  { %v464_v55 = vpop.trf.xlu1 }
 0x1ac   :  { %496 = vmatmul.f32.vlgmr.msra.gmra.mxu0 %v464_v55 }
 0x229   :  { %v497_v57 = vpop.f32.mrf.mxu0 }
 0x22a   :  { %500 = vst [vmem:[#allocation2] sm:$0x1] %v497_v57 }
 0x22b   :  { %511 = dma.vmem_to_hbm [thread:$0]  %s507_s16, 16, %s509_s0, [#allocation3]  }
 0x22c   :  { %642 = dma.done.wait [#allocation3], 16  }
 0x22d   :  { %643 = vsyncadd [#allocation3], 4294967280 }
 0x22e   :  { %516 = vsyncpa [#allocation3], 1 }

</bundles_post_ra>
